<compile_context>
chip_gen: v7x
topology: tpu7x:2x2x1
jax: 0.10.0
libtpu: 0.0.40
codegen_flags: <defaults>
</compile_context>

<pallas_src>
import functools

import jax
import jax.numpy as jnp
from jax.experimental import pallas as pl
from jax.experimental.pallas import tpu as pltpu


# ----------------------------------------------------------------------------
# Helpers
# ----------------------------------------------------------------------------
def _round_up(x, m):
    return ((x + m - 1) // m) * m


def _vmem_limit_bytes():
    # Per-generation VMEM budget (v7x only has 64 MiB physical); leave headroom.
    try:
        cap = int(pltpu.get_tpu_info().vmem_capacity_bytes)
        return min(64 << 20, (cap * 3) // 4)
    except Exception:
        return None


_VMEM_LIMIT = _vmem_limit_bytes()


def _compiler_params(dims):
    kwargs = dict(dimension_semantics=dims)
    if _VMEM_LIMIT is not None:
        kwargs["vmem_limit_bytes"] = _VMEM_LIMIT
    return pltpu.CompilerParams(**kwargs)


# ----------------------------------------------------------------------------
# Pallas kernels
# ----------------------------------------------------------------------------
def _mm_kernel(p_ref, w_ref, b_ref, o_ref, acc_ref, *, relu):
    """Tiled (tm,tk)@(tk,tn) matmul with f32 accumulator; bias+ReLU epilogue."""
    k = pl.program_id(2)

    @pl.when(k == 0)
    def _init():
        acc_ref[...] = jnp.zeros_like(acc_ref)

    acc_ref[...] += jnp.dot(p_ref[...], w_ref[...],
                            preferred_element_type=jnp.float32)

    @pl.when(k == pl.num_programs(2) - 1)
    def _finalize():
        out = acc_ref[...] + b_ref[...]
        if relu:
            out = jnp.maximum(out, 0.0)
        o_ref[...] = out.astype(o_ref.dtype)


def _fused_conv_kernel(x_hbm, w_ref, b_ref, o_ref, xbuf, sem, *, th, w_out, relu):
    """Fused 3x3 conv over one row tile.

    x_hbm: (H+2, W+2, Cin) reflect-padded activation, left in HBM (pl.ANY).
    w_ref: (9, Cin, Cout) bf16 weight taps (tap = kh*3 + kw).
    b_ref: (1, Cout) f32 bias.
    o_ref: (th*W, Cout) f32 output row tile (used as the accumulator).
    xbuf : (th+2, W+2, Cin) f32 VMEM scratch for the halo'd row tile.
    """
    i = pl.program_id(0)
    cp = pltpu.make_async_copy(x_hbm.at[pl.ds(i * th, th + 2)], xbuf, sem.at[0])
    cp.start()
    cp.wait()

    for tap in range(9):
        dy, dx = tap // 3, tap % 3
        win = xbuf[dy:dy + th, dx:dx + w_out, :]          # (th, W, Cin) f32
        win = win.reshape(th * w_out, win.shape[-1])      # W % 8 == 0 -> clean merge
        contrib = jnp.dot(win.astype(jnp.bfloat16), w_ref[tap],
                          preferred_element_type=jnp.float32)
        if tap == 0:
            o_ref[...] = contrib
        else:
            o_ref[...] += contrib

    out = o_ref[...] + b_ref[...]
    if relu:
        out = jnp.maximum(out, 0.0)
    o_ref[...] = out


def _maxpool_kernel(x_ref, o_ref, *, C):
    """2x2/2 max pool; input pre-reshaped (free) to (Hh, 2, Wh, 2*C)."""
    x = x_ref[...]                                  # (t, 2, Wh, 2*C)
    m = jnp.maximum(x[..., :C], x[..., C:])         # max over the horizontal pair
    o_ref[...] = jnp.maximum(m[:, 0], m[:, 1])      # max over the vertical pair


# ----------------------------------------------------------------------------
# Pallas wrappers
# ----------------------------------------------------------------------------
def _matmul_bias_act(p, w, b, relu):
    """(M,K) @ (K,N) + b, optional ReLU.  bf16 MXU operands, f32 accumulation."""
    M, K = p.shape
    _, N = w.shape
    tm = min(512, _round_up(M, 8))
    tn = N if N <= 256 else 256            # MXU-width-aligned, lane-dense output
    tk = K if K <= 512 else 512
    Mp, Kp, Np = _round_up(M, tm), _round_up(K, tk), _round_up(N, tn)

    p_b = jnp.pad(p, ((0, Mp - M), (0, Kp - K))).astype(jnp.bfloat16)
    w_b = jnp.pad(w, ((0, Kp - K), (0, Np - N))).astype(jnp.bfloat16)
    b_b = jnp.pad(b, (0, Np - N)).reshape(1, Np).astype(jnp.float32)

    kernel = functools.partial(_mm_kernel, relu=relu)
    out = pl.pallas_call(
        kernel,
        out_shape=jax.ShapeDtypeStruct((Mp, Np), jnp.float32),
        grid=(Mp // tm, Np // tn, Kp // tk),
        in_specs=[
            pl.BlockSpec((tm, tk), lambda i, j, k: (i, k)),
            pl.BlockSpec((tk, tn), lambda i, j, k: (k, j)),
            pl.BlockSpec((1, tn), lambda i, j, k: (0, j)),
        ],
        out_specs=pl.BlockSpec((tm, tn), lambda i, j, k: (i, j)),
        scratch_shapes=[pltpu.VMEM((tm, tn), jnp.float32)],
        compiler_params=_compiler_params(("parallel", "parallel", "arbitrary")),
    )(p_b, w_b, b_b)
    if (Mp, Np) != (M, N):
        out = out[:M, :N]
    return out


def _row_tile(H, W, Cin, Cout):
    """Largest divisor of H whose halo row buffer / output block stay VMEM-friendly."""
    best = 1
    for th in range(1, H + 1):
        if H % th:
            continue
        xbuf_bytes = (th + 2) * (W + 2) * Cin * 4     # f32 halo row buffer
        oblk_bytes = th * W * Cout * 4                # f32 output block (x2 buffered)
        if xbuf_bytes <= (4 << 20) and oblk_bytes <= (4 << 20):
            best = th
    return best


def _conv3x3_fused(x_pad, w_oihw, b, relu, H, W):
    Hp, Wp, Cin = x_pad.shape
    Cout = w_oihw.shape[0]
    # (Cout, Cin, 3, 3) -> (kh, kw, Cin, Cout) -> (9, Cin, Cout), tap = kh*3 + kw.
    w_taps = jnp.transpose(w_oihw, (2, 3, 1, 0)).reshape(9, Cin, Cout)
    w_taps = w_taps.astype(jnp.bfloat16)
    b2d = b.reshape(1, Cout).astype(jnp.float32)

    th = _row_tile(H, W, Cin, Cout)
    kernel = functools.partial(_fused_conv_kernel, th=th, w_out=W, relu=relu)
    out = pl.pallas_call(
        kernel,
        out_shape=jax.ShapeDtypeStruct((H * W, Cout), jnp.float32),
        grid=(H // th,),
        in_specs=[
            pl.BlockSpec(memory_space=pl.ANY),                 # padded activation (HBM)
            pl.BlockSpec((9, Cin, Cout), lambda i: (0, 0, 0)),  # weights (resident)
            pl.BlockSpec((1, Cout), lambda i: (0, 0)),          # bias
        ],
        out_specs=pl.BlockSpec((th * W, Cout), lambda i: (i, 0)),
        scratch_shapes=[
            pltpu.VMEM((th + 2, Wp, Cin), jnp.float32),
            pltpu.SemaphoreType.DMA((1,)),
        ],
        compiler_params=_compiler_params(("arbitrary",)),
    )(x_pad, w_taps, b2d)
    return out.reshape(H, W, Cout)


def _conv3x3_im2col(x_pad, w_oihw, b, relu, H, W):
    # TODO(synk): reflect padding and this im2col patch build (only used for the
    # tiny 4x4/2x2 deep layers and the Cin=3 first conv) stay as XLA-side glue.
    Hp, Wp, Cin = x_pad.shape
    Cout = w_oihw.shape[0]
    cols = [x_pad[dy:dy + H, dx:dx + W, :] for dy in range(3) for dx in range(3)]
    patches = jnp.stack(cols, axis=2).reshape(H * W, 9 * Cin)
    w_mat = jnp.transpose(w_oihw, (2, 3, 1, 0)).reshape(9 * Cin, Cout)
    out = _matmul_bias_act(patches, w_mat, b, relu)
    return out.reshape(H, W, Cout)


def _conv3x3(x, w_oihw, b, relu):
    """x: (H, W, Cin) f32; w: (Cout, Cin, 3, 3); b: (Cout,) -> (H, W, Cout) f32."""
    H, W, Cin = x.shape
    x_pad = jnp.pad(x, ((1, 1), (1, 1), (0, 0)), mode="reflect")
    if W % 8 == 0 and Cin >= 8:
        try:
            return _conv3x3_fused(x_pad, w_oihw, b, relu, H, W)
        except Exception:
            # Conservative guard: if the fused kernel fails to lower on some TPU
            # generation, fall back to the (also Pallas) tiled-matmul path.
            pass
    return _conv3x3_im2col(x_pad, w_oihw, b, relu, H, W)


def _pool_row_tile(Hh, Wh, C):
    best = 1
    for t in range(1, Hh + 1):
        if Hh % t:
            continue
        if t * 2 * Wh * 2 * C * 4 <= (8 << 20):
            best = t
    return best


def _maxpool2x2(x):
    """x: (H, W, C) f32 -> (H//2, W//2, C), single-read 2x2/2 max pool."""
    H, W, C = x.shape
    Hh, Wh = H // 2, W // 2
    x4 = x.reshape(Hh, 2, Wh, 2 * C)     # contiguous -> free reshape, one HBM read
    t = _pool_row_tile(Hh, Wh, C)
    kernel = functools.partial(_maxpool_kernel, C=C)
    return pl.pallas_call(
        kernel,
        out_shape=jax.ShapeDtypeStruct((Hh, Wh, C), jnp.float32),
        grid=(Hh // t,),
        in_specs=[pl.BlockSpec((t, 2, Wh, 2 * C), lambda i: (i, 0, 0, 0))],
        out_specs=pl.BlockSpec((t, Wh, C), lambda i: (i, 0, 0)),
        compiler_params=_compiler_params(("parallel",)),
    )(x4)


# ----------------------------------------------------------------------------
# VGG19 (truncated, as in the reference module)
# ----------------------------------------------------------------------------
# (type, cin, cout, ksize, relu)
_CFG = [
    ("conv", 3, 3, 1, False),
    ("conv", 3, 64, 3, True),
    ("conv", 64, 64, 3, True),
    ("pool",),
    ("conv", 64, 128, 3, True),
    ("conv", 128, 128, 3, True),
    ("pool",),
    ("conv", 128, 256, 3, True),
    ("conv", 256, 256, 3, True),
    ("conv", 256, 256, 3, True),
    ("conv", 256, 256, 3, True),
    ("pool",),
    ("conv", 256, 512, 3, True),
    ("conv", 512, 512, 3, True),
    ("conv", 512, 512, 3, True),
    ("conv", 512, 512, 3, True),
    ("pool",),
    ("conv", 512, 512, 3, True),
]


def init_params(key):
    """Deterministic synthetic weights (PyTorch OIHW layout), He-style scale."""
    params = []
    for layer in _CFG:
        if layer[0] != "conv":
            params.append(None)
            continue
        _, cin, cout, k, _ = layer
        key, wk, bk = jax.random.split(key, 3)
        fan_in = cin * k * k
        w = jax.random.normal(wk, (cout, cin, k, k), jnp.float32) * (2.0 / fan_in) ** 0.5
        b = jax.random.normal(bk, (cout,), jnp.float32) * 0.01
        params.append((w, b))
    return params


def _fold_1x1(params):
    """Fold the leading 1x1 conv (no ReLU) into the following 3x3 conv (exact)."""
    w1, b1 = params[0]            # (3, 3, 1, 1), (3,)
    w2, b2 = params[1]            # (64, 3, 3, 3), (64,)
    w1m = w1[:, :, 0, 0]          # (c_out1, c_in1)
    w2f = jnp.einsum("ochw,ci->oihw", w2, w1m)
    b2f = b2 + jnp.einsum("ochw,c->o", w2, b1)
    return [None, (w2f, b2f)] + list(params[2:])


def vgg19_forward(x_hwc, params):
    """x_hwc: (H, W, 3) float32 image -> (512, H//16, W//16), matching PyTorch."""
    params = _fold_1x1(params)
    x = x_hwc.astype(jnp.float32)                 # work in HWC internally
    for layer, p in zip(_CFG, params):
        if layer[0] == "conv":
            if p is None:                          # leading 1x1, folded away
                continue
            w, b = p
            relu = layer[4]
            x = _conv3x3(x, w, b, relu)
        else:
            x = _maxpool2x2(x)
    # PyTorch returns CHW (squeeze of NCHW) -> transpose HWC back to CHW.
    return jnp.transpose(x, (2, 0, 1))


if __name__ == "__main__":
    key = jax.random.PRNGKey(0)
    pkey, xkey = jax.random.split(key)
    params = init_params(pkey)

    # Small HWC "image": 32x32x3 (divisible by 16 so all 4 maxpools apply).
    x = jax.random.normal(xkey, (32, 32, 3), jnp.float32)

    out = vgg19_forward(x, params)
    out = jax.block_until_ready(out)

    assert out.shape == (512, 2, 2), out.shape
    assert out.dtype == jnp.float32
    assert bool(jnp.all(jnp.isfinite(out)))
    print("KERNEL_OK")
</pallas_src>

<mosaic_0001>
module attributes {stable_mosaic.version = 11 : i64} {
  func.func @_mm_kernel(%arg0: i32, %arg1: i32, %arg2: i32, %arg3: memref<512x27xbf16, #tpu.memory_space<vmem>>, %arg4: memref<27x64xbf16, #tpu.memory_space<vmem>>, %arg5: memref<1x64xf32, #tpu.memory_space<vmem>>, %arg6: memref<512x64xf32, #tpu.memory_space<vmem>>, %arg7: memref<512x64xf32, #tpu.memory_space<vmem>>) attributes {dimension_semantics = [#tpu.dimension_semantics<parallel>, #tpu.dimension_semantics<parallel>, #tpu.dimension_semantics<arbitrary>], iteration_bounds = array<i64: 2, 1, 1>, scalar_prefetch = 0 : i64, scratch_operands = 1 : i64, tpu.core_type = #tpu.core_type<tc>, window_params = [{transform_indices = @transform_0, window_bounds = array<i64: 512, 27>}, {transform_indices = @transform_1, window_bounds = array<i64: 27, 64>}, {transform_indices = @transform_2, window_bounds = array<i64: 1, 64>}, {transform_indices = @transform_3, window_bounds = array<i64: 512, 64>}]} {
    %c0_i32 = arith.constant 0 : i32
    %0 = arith.cmpi eq, %arg2, %c0_i32 : i32
    %1 = arith.extui %0 : i1 to i32
    %c0_i32_0 = arith.constant 0 : i32
    %2 = arith.cmpi ne, %1, %c0_i32_0 : i32
    scf.if %2 {
      %cst_10 = arith.constant 0.000000e+00 : f32
      %12 = vector.broadcast %cst_10 : f32 to vector<512x64xf32>
      %c0_11 = arith.constant 0 : index
      %c0_12 = arith.constant 0 : index
      %13 = vector.load %arg7[%c0_11, %c0_12] : memref<512x64xf32, #tpu.memory_space<vmem>>, vector<512x64xf32>
      tpu.vector_store %arg7[%c0_11, %c0_12], %12 {strides = array<i32>} : memref<512x64xf32, #tpu.memory_space<vmem>>, vector<512x64xf32>,
    } else {
    }
    %c0 = arith.constant 0 : index
    %c0_1 = arith.constant 0 : index
    %3 = vector.load %arg7[%c0, %c0_1] : memref<512x64xf32, #tpu.memory_space<vmem>>, vector<512x64xf32>
    %c0_2 = arith.constant 0 : index
    %c0_3 = arith.constant 0 : index
    %4 = vector.load %arg3[%c0_2, %c0_3] : memref<512x27xbf16, #tpu.memory_space<vmem>>, vector<512x27xbf16>
    %c0_4 = arith.constant 0 : index
    %c0_5 = arith.constant 0 : index
    %5 = vector.load %arg4[%c0_4, %c0_5] : memref<27x64xbf16, #tpu.memory_space<vmem>>, vector<27x64xbf16>
    %cst = arith.constant dense<0.000000e+00> : vector<512x64xf32>
    %6 = tpu.matmul %4, %5, %cst {dimension_numbers = #tpu.dot_dimension_numbers<[1], [0], [0], [1], [0, 0, 1, 1], [], []>} : vector<512x27xbf16>, vector<27x64xbf16>, vector<512x64xf32> -> vector<512x64xf32>
    %7 = arith.addf %3, %6 : vector<512x64xf32>
    %c0_6 = arith.constant 0 : index
    %c0_7 = arith.constant 0 : index
    %8 = vector.load %arg7[%c0_6, %c0_7] : memref<512x64xf32, #tpu.memory_space<vmem>>, vector<512x64xf32>
    tpu.vector_store %arg7[%c0_6, %c0_7], %7 {strides = array<i32>} : memref<512x64xf32, #tpu.memory_space<vmem>>, vector<512x64xf32>,
    %c0_i32_8 = arith.constant 0 : i32
    %9 = arith.cmpi eq, %arg2, %c0_i32_8 : i32
    %10 = arith.extui %9 : i1 to i32
    %c0_i32_9 = arith.constant 0 : i32
    %11 = arith.cmpi ne, %10, %c0_i32_9 : i32
    scf.if %11 {
      %c0_10 = arith.constant 0 : index
      %c0_11 = arith.constant 0 : index
      %12 = vector.load %arg7[%c0_10, %c0_11] : memref<512x64xf32, #tpu.memory_space<vmem>>, vector<512x64xf32>
      %c0_12 = arith.constant 0 : index
      %c0_13 = arith.constant 0 : index
      %13 = vector.load %arg5[%c0_12, %c0_13] : memref<1x64xf32, #tpu.memory_space<vmem>>, vector<1x64xf32>
      %14 = vector.broadcast %13 : vector<1x64xf32> to vector<512x64xf32>
      %15 = arith.addf %12, %14 : vector<512x64xf32>
      %cst_14 = arith.constant 0.000000e+00 : f32
      %16 = vector.broadcast %cst_14 : f32 to vector<512x64xf32>
      %17 = arith.maximumf %15, %16 : vector<512x64xf32>
      %c0_15 = arith.constant 0 : index
      %c0_16 = arith.constant 0 : index
      %18 = vector.load %arg6[%c0_15, %c0_16] : memref<512x64xf32, #tpu.memory_space<vmem>>, vector<512x64xf32>
      tpu.vector_store %arg6[%c0_15, %c0_16], %17 {strides = array<i32>} : memref<512x64xf32, #tpu.memory_space<vmem>>, vector<512x64xf32>,
    } else {
    }
    return
  }
  func.func @transform_0(%arg0: i32, %arg1: i32, %arg2: i32) -> (i32, i32) {
    %c0_i32 = arith.constant 0 : i32
    return %arg0, %arg2 : i32, i32
  }
  func.func @transform_1(%arg0: i32, %arg1: i32, %arg2: i32) -> (i32, i32) {
    %c0_i32 = arith.constant 0 : i32
    return %arg2, %arg1 : i32, i32
  }
  func.func @transform_2(%arg0: i32, %arg1: i32, %arg2: i32) -> (i32, i32) {
    %c0_i32 = arith.constant 0 : i32
    %c0_i32_0 = arith.constant 0 : i32
    return %c0_i32, %arg1 : i32, i32
  }
  func.func @transform_3(%arg0: i32, %arg1: i32, %arg2: i32) -> (i32, i32) {
    %c0_i32 = arith.constant 0 : i32
    return %arg0, %arg1 : i32, i32
  }
}

</mosaic_0001>

<bundles_post_ra>
// kernel: tpu_custom_call.1
= control target key start
LH: loop header
LB: loop body
LE: loop exit
PB: predicated region body
PF: predicated region fallthrough
CT: control target
= control target key end

     0   :  { %s1823_s12 = smov 0   ;;  %s1825_s13 = smov 0   ;;  %s2342_s0 = inlined_call_operand.vmem [shape: bf16[1024,27], index: 0, kind: input, shape index: {}]   ;;  %s2343_s1 = inlined_call_operand.vmem [shape: bf16[27,64], index: 1, kind: input, shape index: {}]   ;;  %s2344_s2 = inlined_call_operand.vmem [shape: f32[1,64], index: 2, kind: input, shape index: {}]   ;;  %s2345_s3 = inlined_call_operand.vmem [shape: f32[1024,64], index: 3, kind: output, shape index: {}]  }
   0x1   :  { %s1827_s14 = smov 0  }
   0x2 LB: > { %s32_s15 = sadd.s32 1, %s1795_s13  ;;  %p1537_p0 = scmp.ge.s32.totalorder %s1799_s14, 1  ;;  %s1799_s14 = sphi %s1827_s14, %s13_s14   ;;  %s1795_s13 = sphi %s1825_s13, %s2348_s13   ;;  %s1791_s12 = sphi %s1823_s12, %s2347_s12  }
   0x3   : > { %p34_p1 = scmp.ge.s32.totalorder %s32_s15, 2  ;;  %p188_p2 = scmp.lt.s32.totalorder %s1799_s14, 3 }
   0x5   : > { %s2350_s15 = smov (%p34_p1, %s32_s15), 0  ;;  %p189_p3 = pnand %p1537_p0, %p188_p2 }
   0x6   : > { %v1743_v0 = vld [vmem:[%s2343_s1] sm:$0xff] (!%p189_p3)   ;;  %vm729_vm0 = vcmask (!%p189_p3), 1044480   ;;  %v1849_v1 = vld [vmem:[%s2343_s1 + $0x8] sm:$0x3f] (!%p189_p3)   ;;  %vm730_vm1 = vcmask (!%p189_p3), 1045504   ;;  %s1538_s20 = sshll.u32 (!%p189_p3), %s1791_s12, 6 }
   0x7   : > { %192 = sbr.rel (%p189_p3) target bundleno = 308 (0x134), region = 32  ;;  %1645 = vmatprep.subr.bf16.mxu0 (!%p189_p3), %v1743_v0  ;;  %1713 = vmatprep.subr.bf16.mxu1 (!%p189_p3), %v1743_v0  ;;  %vm264_vm2 = vcmask (!%p189_p3), 523264   ;;  %v1801_v2 = vmov (!%p189_p3), 65535   ;;  %p1854_p4 = scmp.lt.s32.totalorder (!%p189_p3), %s1538_s20, 127  ;;  %v1802_v5 = vmov (!%p189_p3), 0.0   ;;  %vm632_vm3 = vcmask (!%p189_p3), 220160  }
   0x8   : > { %1646 = vmatpush3.bf16.msra.mxu0 (!%p189_p3), %v1743_v0  ;;  %1715 = vmatpush3.bf16.msra.mxu1 (!%p189_p3), %v1743_v0  ;;  %v731_v3 = vsel (!%p189_p3), %vm729_vm0, 4294967295, %v1801_v2  ;;  %267 = vst.msk [vmem:[#allocation2 + $0x10] sm:$0xff] (!%p189_p3), %vm264_vm2, %v1802_v5  ;;  %265 = vst.msk [vmem:[#allocation2] sm:$0xff] (!%p189_p3), %vm264_vm2, %v1802_v5  ;;  %v2077_v2 = vld [vmem:[%s2344_s2] ss:$0 sm:$0xff] (!%p189_p3) }
   0x9   : > { %v1858_v4 = vsel (!%p189_p3), %vm730_vm1, %v731_v3, 0  ;;  %266 = vst.msk [vmem:[#allocation2 + $0x8] sm:$0xff] (!%p189_p3), %vm264_vm2, %v1802_v5  ;;  %268 = vst.msk [vmem:[#allocation2 + $0x18] sm:$0xff] (!%p189_p3), %vm264_vm2, %v1802_v5 }
   0xa   : > { %269 = vst.msk [vmem:[#allocation2 + $0x20] sm:$0xff] (!%p189_p3), %vm264_vm2, %v1802_v5  ;;  %270 = vst.msk [vmem:[#allocation2 + $0x28] sm:$0xff] (!%p189_p3), %vm264_vm2, %v1802_v5  ;;  %v734_v6 = vand.u32 (!%p189_p3), %v1849_v1, %v1858_v4 }
   0xb   : > { %271 = vst.msk [vmem:[#allocation2 + $0x30] sm:$0xff] (!%p189_p3), %vm264_vm2, %v1802_v5  ;;  %272 = vst.msk [vmem:[#allocation2 + $0x38] sm:$0xff] (!%p189_p3), %vm264_vm2, %v1802_v5 }
   0xc   : > { %273 = vst.msk [vmem:[#allocation2 + $0x40] sm:$0xff] (!%p189_p3), %vm264_vm2, %v1802_v5  ;;  %274 = vst.msk [vmem:[#allocation2 + $0x48] sm:$0xff] (!%p189_p3), %vm264_vm2, %v1802_v5  ;;  %1647 = vmatprep.subr.bf16.mxu0 (!%p189_p3), %v734_v6  ;;  %1714 = vmatprep.subr.bf16.mxu1 (!%p189_p3), %v734_v6 }
   0xd   : > { %275 = vst.msk [vmem:[#allocation2 + $0x50] sm:$0xff] (!%p189_p3), %vm264_vm2, %v1802_v5  ;;  %276 = vst.msk [vmem:[#allocation2 + $0x58] sm:$0xff] (!%p189_p3), %vm264_vm2, %v1802_v5  ;;  %1648 = vmatpush3.bf16.msra.mxu0 (!%p189_p3), %v734_v6  ;;  %1716 = vmatpush3.bf16.msra.mxu1 (!%p189_p3), %v734_v6 }
   0xe   : > { %277 = vst.msk [vmem:[#allocation2 + $0x60] sm:$0xff] %vm264_vm2, %v1802_v5  ;;  %278 = vst.msk [vmem:[#allocation2 + $0x68] sm:$0xff] %vm264_vm2, %v1802_v5  ;;  %s2352_s20 = smov (!%p1854_p4, %s1538_s20), 127 }
   0xf   : > { %279 = vst.msk [vmem:[#allocation2 + $0x70] sm:$0xff] %vm264_vm2, %v1802_v5  ;;  %280 = vst.msk [vmem:[#allocation2 + $0x78] sm:$0xff] %vm264_vm2, %v1802_v5  ;;  %s1539_s22 = sshll.u32 %s2352_s20, 2  ;;  %v331_v39 = vld [vmem:[#allocation2 + $0x10] sm:$0xff]  ;;  %v329_v41 = vld [vmem:[#allocation2] sm:$0xff]  ;;  %s1541_s28 = sshll.u32 %s2352_s20, 3 }
  0x10   : > { %281 = vst.msk [vmem:[#allocation2 + $0x80] sm:$0xff] %vm264_vm2, %v1802_v5  ;;  %282 = vst.msk [vmem:[#allocation2 + $0x88] sm:$0xff] %vm264_vm2, %v1802_v5  ;;  %s2000_s25 = scalar_lea.vmem %s2342_s0, %s1539_s22  ;;  %v332_v44 = vld [vmem:[#allocation2 + $0x18] sm:$0xff]  ;;  %v330_v49 = vld [vmem:[#allocation2 + $0x8] sm:$0xff]  ;;  %s2085_s4 = scalar_lea.vmem %s2345_s3, %s1541_s28 }
  0x11   : > { %283 = vst.msk [vmem:[#allocation2 + $0x90] sm:$0xff] %vm264_vm2, %v1802_v5  ;;  %284 = vst.msk [vmem:[#allocation2 + $0x98] sm:$0xff] %vm264_vm2, %v1802_v5  ;;  %v1745_v7 = vld [vmem:[%s2000_s25] sm:$0xff]   ;;  %v1747_v9 = vld [vmem:[%s2000_s25 + $0x8] sm:$0xff]  }
  0x12   : > { %285 = vst.msk [vmem:[#allocation2 + $0xa0] sm:$0xff] %vm264_vm2, %v1802_v5  ;;  %286 = vst.msk [vmem:[#allocation2 + $0xa8] sm:$0xff] %vm264_vm2, %v1802_v5  ;;  %v1746_v8 = vld [vmem:[%s2000_s25 + $0x80] sm:$0xff]   ;;  %1649 = vmatprep.mubr.msk.bf16.mxu0 %vm632_vm3, %v1745_v7  ;;  %v1748_v10 = vld [vmem:[%s2000_s25 + $0x88] sm:$0xff]  }
  0x13   : > { %287 = vst.msk [vmem:[#allocation2 + $0xb0] sm:$0xff] %vm264_vm2, %v1802_v5  ;;  %288 = vst.msk [vmem:[#allocation2 + $0xb8] sm:$0xff] %vm264_vm2, %v1802_v5  ;;  %1681 = vmatprep.mubr.msk.bf16.mxu1 %vm632_vm3, %v1746_v8  ;;  %1650 = vmatmul.mubr.msk.bf16.vlgmr.msra.gmra.mrb[0].mxu0 %vm632_vm3, %v1747_v9  ;;  %v1749_v11 = vld [vmem:[%s2000_s25 + $0x10] sm:$0xff]   ;;  %v1751_v13 = vld [vmem:[%s2000_s25 + $0x18] sm:$0xff]  }
  0x14   : > { %289 = vst.msk [vmem:[#allocation2 + $0xc0] sm:$0xff] %vm264_vm2, %v1802_v5  ;;  %290 = vst.msk [vmem:[#allocation2 + $0xc8] sm:$0xff] %vm264_vm2, %v1802_v5  ;;  %1682 = vmatmul.mubr.msk.bf16.vlgmr.msra.gmra.mrb[0].mxu1 %vm632_vm3, %v1748_v10  ;;  %v1750_v12 = vld [vmem:[%s2000_s25 + $0x90] sm:$0xff]   ;;  %1653 = vmatprep.mubr.msk.bf16.mxu0 %vm632_vm3, %v1749_v11  ;;  %v1752_v14 = vld [vmem:[%s2000_s25 + $0x98] sm:$0xff]  }
  0x15   : > { %291 = vst.msk [vmem:[#allocation2 + $0xd0] sm:$0xff] %vm264_vm2, %v1802_v5  ;;  %292 = vst.msk [vmem:[#allocation2 + $0xd8] sm:$0xff] %vm264_vm2, %v1802_v5  ;;  %1685 = vmatprep.mubr.msk.bf16.mxu1 %vm632_vm3, %v1750_v12  ;;  %v1753_v15 = vld [vmem:[%s2000_s25 + $0x20] sm:$0xff]   ;;  %v1755_v17 = vld [vmem:[%s2000_s25 + $0x28] sm:$0xff]  }
  0x16   : > { %293 = vst.msk [vmem:[#allocation2 + $0xe0] sm:$0xff] %vm264_vm2, %v1802_v5  ;;  %294 = vst.msk [vmem:[#allocation2 + $0xe8] sm:$0xff] %vm264_vm2, %v1802_v5  ;;  %v1754_v16 = vld [vmem:[%s2000_s25 + $0xa0] sm:$0xff]   ;;  %v1756_v18 = vld [vmem:[%s2000_s25 + $0xa8] sm:$0xff]  }
  0x17   : > { %295 = vst.msk [vmem:[#allocation2 + $0xf0] sm:$0xff] %vm264_vm2, %v1802_v5  ;;  %296 = vst.msk [vmem:[#allocation2 + $0xf8] sm:$0xff] %vm264_vm2, %v1802_v5  ;;  %v1757_v19 = vld [vmem:[%s2000_s25 + $0x30] sm:$0xff]   ;;  %v1759_v21 = vld [vmem:[%s2000_s25 + $0x38] sm:$0xff]  }
  0x18   : > { %297 = vst.msk [vmem:[#allocation2 + $0x100] sm:$0xff] %vm264_vm2, %v1802_v5  ;;  %298 = vst.msk [vmem:[#allocation2 + $0x108] sm:$0xff] %vm264_vm2, %v1802_v5  ;;  %v1758_v20 = vld [vmem:[%s2000_s25 + $0xb0] sm:$0xff]   ;;  %v1760_v22 = vld [vmem:[%s2000_s25 + $0xb8] sm:$0xff]  }
  0x19   : > { %299 = vst.msk [vmem:[#allocation2 + $0x110] sm:$0xff] %vm264_vm2, %v1802_v5  ;;  %300 = vst.msk [vmem:[#allocation2 + $0x118] sm:$0xff] %vm264_vm2, %v1802_v5  ;;  %v1761_v23 = vld [vmem:[%s2000_s25 + $0x40] sm:$0xff]   ;;  %v1763_v25 = vld [vmem:[%s2000_s25 + $0x48] sm:$0xff]  }
  0x1a   : > { %301 = vst.msk [vmem:[#allocation2 + $0x120] sm:$0xff] %vm264_vm2, %v1802_v5  ;;  %302 = vst.msk [vmem:[#allocation2 + $0x128] sm:$0xff] %vm264_vm2, %v1802_v5  ;;  %v1762_v24 = vld [vmem:[%s2000_s25 + $0xc0] sm:$0xff]   ;;  %v1764_v26 = vld [vmem:[%s2000_s25 + $0xc8] sm:$0xff]  }
  0x1b   : > { %303 = vst.msk [vmem:[#allocation2 + $0x130] sm:$0xff] %vm264_vm2, %v1802_v5  ;;  %304 = vst.msk [vmem:[#allocation2 + $0x138] sm:$0xff] %vm264_vm2, %v1802_v5  ;;  %1654 = vmatmul.mubr.msk.bf16.gmra.mrb[4].mxu0 %vm632_vm3, %v1751_v13  ;;  %v1765_v27 = vld [vmem:[%s2000_s25 + $0x50] sm:$0xff]   ;;  %v1767_v29 = vld [vmem:[%s2000_s25 + $0x58] sm:$0xff]  }
  0x1c   : > { %305 = vst.msk [vmem:[#allocation2 + $0x140] sm:$0xff] %vm264_vm2, %v1802_v5  ;;  %306 = vst.msk [vmem:[#allocation2 + $0x148] sm:$0xff] %vm264_vm2, %v1802_v5  ;;  %1686 = vmatmul.mubr.msk.bf16.gmra.mrb[4].mxu1 %vm632_vm3, %v1752_v14  ;;  %1657 = vmatprep.mubr.msk.bf16.mxu0 %vm632_vm3, %v1753_v15  ;;  %v1766_v28 = vld [vmem:[%s2000_s25 + $0xd0] sm:$0xff]   ;;  %v1768_v30 = vld [vmem:[%s2000_s25 + $0xd8] sm:$0xff]  }
  0x1d   : > { %307 = vst.msk [vmem:[#allocation2 + $0x150] sm:$0xff] %vm264_vm2, %v1802_v5  ;;  %308 = vst.msk [vmem:[#allocation2 + $0x158] sm:$0xff] %vm264_vm2, %v1802_v5  ;;  %1689 = vmatprep.mubr.msk.bf16.mxu1 %vm632_vm3, %v1754_v16  ;;  %v1769_v31 = vld [vmem:[%s2000_s25 + $0x60] sm:$0xff]   ;;  %v1771_v33 = vld [vmem:[%s2000_s25 + $0x68] sm:$0xff]  }
  0x1e   : > { %309 = vst.msk [vmem:[#allocation2 + $0x160] sm:$0xff] %vm264_vm2, %v1802_v5  ;;  %310 = vst.msk [vmem:[#allocation2 + $0x168] sm:$0xff] %vm264_vm2, %v1802_v5  ;;  %v1770_v32 = vld [vmem:[%s2000_s25 + $0xe0] sm:$0xff]   ;;  %v1772_v34 = vld [vmem:[%s2000_s25 + $0xe8] sm:$0xff]  }
  0x1f   : > { %311 = vst.msk [vmem:[#allocation2 + $0x170] sm:$0xff] %vm264_vm2, %v1802_v5  ;;  %312 = vst.msk [vmem:[#allocation2 + $0x178] sm:$0xff] %vm264_vm2, %v1802_v5  ;;  %v1773_v35 = vld [vmem:[%s2000_s25 + $0x70] sm:$0xff]   ;;  %v1775_v37 = vld [vmem:[%s2000_s25 + $0x78] sm:$0xff]  }
  0x20   : > { %313 = vst.msk [vmem:[#allocation2 + $0x180] sm:$0xff] %vm264_vm2, %v1802_v5  ;;  %314 = vst.msk [vmem:[#allocation2 + $0x188] sm:$0xff] %vm264_vm2, %v1802_v5  ;;  %v1774_v36 = vld [vmem:[%s2000_s25 + $0xf0] sm:$0xff]   ;;  %v1776_v38 = vld [vmem:[%s2000_s25 + $0xf8] sm:$0xff]  }
  0x21   : > { %315 = vst.msk [vmem:[#allocation2 + $0x190] sm:$0xff] %vm264_vm2, %v1802_v5  ;;  %316 = vst.msk [vmem:[#allocation2 + $0x198] sm:$0xff] %vm264_vm2, %v1802_v5  ;;  %v363_v40 = vld [vmem:[#allocation2 + $0x110] sm:$0xff]  ;;  %v361_v43 = vld [vmem:[#allocation2 + $0x100] sm:$0xff] }
  0x22   : > { %317 = vst.msk [vmem:[#allocation2 + $0x1a0] sm:$0xff] %vm264_vm2, %v1802_v5  ;;  %318 = vst.msk [vmem:[#allocation2 + $0x1a8] sm:$0xff] %vm264_vm2, %v1802_v5  ;;  %v364_v48 = vld [vmem:[#allocation2 + $0x118] sm:$0xff]  ;;  %v362_v54 = vld [vmem:[#allocation2 + $0x108] sm:$0xff] }
  0x23   : > { %319 = vst.msk [vmem:[#allocation2 + $0x1b0] sm:$0xff] %vm264_vm2, %v1802_v5  ;;  %320 = vst.msk [vmem:[#allocation2 + $0x1b8] sm:$0xff] %vm264_vm2, %v1802_v5  ;;  %1658 = vmatmul.mubr.msk.bf16.gmra.mrb[8].mxu0 %vm632_vm3, %v1755_v17  ;;  %v335_v63 = vld [vmem:[#allocation2 + $0x30] sm:$0xff]  ;;  %v333_v1 = vld [vmem:[#allocation2 + $0x20] sm:$0xff] }
  0x24   : > { %321 = vst.msk [vmem:[#allocation2 + $0x1c0] sm:$0xff] %vm264_vm2, %v1802_v5  ;;  %322 = vst.msk [vmem:[#allocation2 + $0x1c8] sm:$0xff] %vm264_vm2, %v1802_v5  ;;  %1690 = vmatmul.mubr.msk.bf16.gmra.mrb[8].mxu1 %vm632_vm3, %v1756_v18  ;;  %1661 = vmatprep.mubr.msk.bf16.mxu0 %vm632_vm3, %v1757_v19  ;;  %v367_v0 = vld [vmem:[#allocation2 + $0x130] sm:$0xff]  ;;  %v365_v4 = vld [vmem:[#allocation2 + $0x120] sm:$0xff] }
  0x25   : > { %323 = vst.msk [vmem:[#allocation2 + $0x1d0] sm:$0xff] %vm264_vm2, %v1802_v5  ;;  %324 = vst.msk [vmem:[#allocation2 + $0x1d8] sm:$0xff] %vm264_vm2, %v1802_v5  ;;  %1693 = vmatprep.mubr.msk.bf16.mxu1 %vm632_vm3, %v1758_v20  ;;  %v368_v9 = vld [vmem:[#allocation2 + $0x138] sm:$0xff]  ;;  %v334_v10 = vld [vmem:[#allocation2 + $0x28] sm:$0xff] }
  0x26   : > { %325 = vst.msk [vmem:[#allocation2 + $0x1e0] sm:$0xff] %vm264_vm2, %v1802_v5  ;;  %326 = vst.msk [vmem:[#allocation2 + $0x1e8] sm:$0xff] %vm264_vm2, %v1802_v5  ;;  %v366_v16 = vld [vmem:[#allocation2 + $0x128] sm:$0xff] }
  0x27   : > { %327 = vst.msk [vmem:[#allocation2 + $0x1f0] sm:$0xff] %vm264_vm2, %v1802_v5  ;;  %328 = vst.msk [vmem:[#allocation2 + $0x1f8] sm:$0xff] %vm264_vm2, %v1802_v5  ;;  %v336_v5 = vld [vmem:[#allocation2 + $0x38] sm:$0xff] }
  0x2b   : > { %1662 = vmatmul.mubr.msk.bf16.gmra.mrb[12].mxu0 %vm632_vm3, %v1759_v21 }
  0x2c   : > { %1694 = vmatmul.mubr.msk.bf16.gmra.mrb[12].mxu1 %vm632_vm3, %v1760_v22  ;;  %1665 = vmatprep.mubr.msk.bf16.mxu0 %vm632_vm3, %v1761_v23 }
  0x2d   : > { %1697 = vmatprep.mubr.msk.bf16.mxu1 %vm632_vm3, %v1762_v24 }
  0x33   : > { %1666 = vmatmul.mubr.msk.bf16.gmra.mrb[16].mxu0 %vm632_vm3, %v1763_v25 }
  0x34   : > { %1698 = vmatmul.mubr.msk.bf16.gmra.mrb[16].mxu1 %vm632_vm3, %v1764_v26  ;;  %1669 = vmatprep.mubr.msk.bf16.mxu0 %vm632_vm3, %v1765_v27 }
  0x35   : > { %1701 = vmatprep.mubr.msk.bf16.mxu1 %vm632_vm3, %v1766_v28 }
  0x3b   : > { %1670 = vmatmul.mubr.msk.bf16.gmra.mrb[20].mxu0 %vm632_vm3, %v1767_v29 }
  0x3c   : > { %1702 = vmatmul.mubr.msk.bf16.gmra.mrb[20].mxu1 %vm632_vm3, %v1768_v30  ;;  %1673 = vmatprep.mubr.msk.bf16.mxu0 %vm632_vm3, %v1769_v31 }
  0x3d   : > { %1705 = vmatprep.mubr.msk.bf16.mxu1 %vm632_vm3, %v1770_v32 }
  0x43   : > { %1674 = vmatmul.mubr.msk.bf16.gmra.mrb[24].mxu0 %vm632_vm3, %v1771_v33 }
  0x44   : > { %1706 = vmatmul.mubr.msk.bf16.gmra.mrb[24].mxu1 %vm632_vm3, %v1772_v34  ;;  %1677 = vmatprep.mubr.msk.bf16.mxu0 %vm632_vm3, %v1773_v35 }
  0x45   : > { %1709 = vmatprep.mubr.msk.bf16.mxu1 %vm632_vm3, %v1774_v36 }
  0x4b   : > { %1678 = vmatmul.mubr.msk.bf16.gmra.mrb[28].mxu0 %vm632_vm3, %v1775_v37 }
  0x4c   : > { %1710 = vmatmul.mubr.msk.bf16.gmra.mrb[28].mxu1 %vm632_vm3, %v1776_v38 }
  0xe6   : > { %v1651_v42 = vpop.f32.mrb[0].mxu0 }
  0xe7   : > { %v1027_v45 = vadd.f32 %v1651_v42, %v331_v39  ;;  %v1683_v46 = vpop.f32.mrb[0].mxu1  ;;  %v770_v47 = vpop.f32.mrb[1].mxu0  ;;  %v339_v42 = vld [vmem:[#allocation2 + $0x50] sm:$0xff] }
  0xe8   : > { %v1059_v50 = vadd.f32 %v1683_v46, %v363_v40  ;;  %v1025_v51 = vadd.f32 %v770_v47, %v329_v41  ;;  %v898_v52 = vpop.f32.mrb[1].mxu1  ;;  %v1652_v53 = vpop.f32.mrb[2].mxu0  ;;  %v371_v46 = vld [vmem:[#allocation2 + $0x150] sm:$0xff]  ;;  %v337_v47 = vld [vmem:[#allocation2 + $0x40] sm:$0xff] }
  0xe9   : > { %1092 = vst.msk [vmem:[#allocation2 + $0x10] sm:$0xff] %vm264_vm2, %v1027_v45  ;;  %v1057_v55 = vadd.f32 %v898_v52, %v361_v43  ;;  %v1028_v56 = vadd.f32 %v1652_v53, %v332_v44  ;;  %v1684_v57 = vpop.f32.mrb[2].mxu1  ;;  %v773_v58 = vpop.f32.mrb[3].mxu0  ;;  %v340_v52 = vld [vmem:[#allocation2 + $0x58] sm:$0xff] }
  0xea   : > { %1124 = vst.msk [vmem:[#allocation2 + $0x110] sm:$0xff] %vm264_vm2, %v1059_v50  ;;  %1090 = vst.msk [vmem:[#allocation2] sm:$0xff] %vm264_vm2, %v1025_v51  ;;  %v1060_v59 = vadd.f32 %v1684_v57, %v364_v48  ;;  %v1026_v60 = vadd.f32 %v773_v58, %v330_v49  ;;  %v901_v61 = vpop.f32.mrb[3].mxu1  ;;  %v369_v51 = vld [vmem:[#allocation2 + $0x140] sm:$0xff]  ;;  %v372_v57 = vld [vmem:[#allocation2 + $0x158] sm:$0xff] }
  0xeb   : > { %1122 = vst.msk [vmem:[#allocation2 + $0x100] sm:$0xff] %vm264_vm2, %v1057_v55  ;;  %1093 = vst.msk [vmem:[#allocation2 + $0x18] sm:$0xff] %vm264_vm2, %v1028_v56  ;;  %v1058_v62 = vadd.f32 %v901_v61, %v362_v54  ;;  %v338_v58 = vld [vmem:[#allocation2 + $0x48] sm:$0xff] }
  0xec   : > { %1125 = vst.msk [vmem:[#allocation2 + $0x118] sm:$0xff] %vm264_vm2, %v1060_v59  ;;  %1091 = vst.msk [vmem:[#allocation2 + $0x8] sm:$0xff] %vm264_vm2, %v1026_v60 }
  0xed   : > { %1123 = vst.msk [vmem:[#allocation2 + $0x108] sm:$0xff] %vm264_vm2, %v1058_v62 }
  0xee   : > { %v1655_v3 = vpop.f32.mrb[4].mxu0 }
  0xef   : > { %v1031_v6 = vadd.f32 %v1655_v3, %v335_v63  ;;  %v1687_v7 = vpop.f32.mrb[4].mxu1  ;;  %v786_v8 = vpop.f32.mrb[5].mxu0 }
  0xf0   : > { %v1159_v11 = vld [vmem:[#allocation2 + $0x10] sm:$0xff]  ;;  %v1063_v12 = vadd.f32 %v1687_v7, %v367_v0  ;;  %v1029_v13 = vadd.f32 %v786_v8, %v333_v1  ;;  %v914_v14 = vpop.f32.mrb[5].mxu1  ;;  %v1656_v15 = vpop.f32.mrb[6].mxu0  ;;  %v370_v0 = vld [vmem:[#allocation2 + $0x148] sm:$0xff] }
  0xf1   : > { %v1230_v17 = vadd.f32 %v2077_v2, %v1159_v11  ;;  %v1191_v18 = vld [vmem:[#allocation2 + $0x110] sm:$0xff]  ;;  %v1157_v19 = vld [vmem:[#allocation2] sm:$0xff]  ;;  %1096 = vst.msk [vmem:[#allocation2 + $0x30] sm:$0xff] %vm264_vm2, %v1031_v6  ;;  %v1061_v20 = vadd.f32 %v914_v14, %v365_v4  ;;  %v1032_v21 = vadd.f32 %v1656_v15, %v336_v5  ;;  %v1688_v22 = vpop.f32.mrb[6].mxu1  ;;  %v789_v23 = vpop.f32.mrb[7].mxu0 }
  0xf2   : > { %v1262_v24 = vadd.f32 %v2077_v2, %v1191_v18  ;;  %v1228_v25 = vadd.f32 %v2077_v2, %v1157_v19  ;;  %v1189_v26 = vld [vmem:[#allocation2 + $0x100] sm:$0xff]  ;;  %v1160_v27 = vld [vmem:[#allocation2 + $0x18] sm:$0xff]  ;;  %1128 = vst.msk [vmem:[#allocation2 + $0x130] sm:$0xff] %vm264_vm2, %v1063_v12  ;;  %1094 = vst.msk [vmem:[#allocation2 + $0x20] sm:$0xff] %vm264_vm2, %v1029_v13  ;;  %v1064_v28 = vadd.f32 %v1688_v22, %v368_v9  ;;  %v917_v30 = vpop.f32.mrb[7].mxu1 }
  0xf3   : > { %v1030_v29 = vadd.f32 %v789_v23, %v334_v10  ;;  %v1294_v31 = vmax.f32 %v1230_v17, 0.0  ;;  %v1260_v32 = vadd.f32 %v2077_v2, %v1189_v26  ;;  %v1231_v33 = vadd.f32 %v2077_v2, %v1160_v27  ;;  %v1192_v34 = vld [vmem:[#allocation2 + $0x118] sm:$0xff]  ;;  %v1158_v35 = vld [vmem:[#allocation2 + $0x8] sm:$0xff]  ;;  %1126 = vst.msk [vmem:[#allocation2 + $0x120] sm:$0xff] %vm264_vm2, %v1061_v20  ;;  %1097 = vst.msk [vmem:[#allocation2 + $0x38] sm:$0xff] %vm264_vm2, %v1032_v21 }
  0xf4   : > { %v1062_v36 = vadd.f32 %v917_v30, %v366_v16  ;;  %v1326_v37 = vmax.f32 %v1262_v24, 0.0  ;;  %v1292_v38 = vmax.f32 %v1228_v25, 0.0  ;;  %v1263_v39 = vadd.f32 %v2077_v2, %v1192_v34  ;;  %v1190_v41 = vld [vmem:[#allocation2 + $0x108] sm:$0xff]  ;;  %1129 = vst.msk [vmem:[#allocation2 + $0x138] sm:$0xff] %vm264_vm2, %v1064_v28  ;;  %v343_v27 = vld [vmem:[#allocation2 + $0x70] sm:$0xff] }
  0xf5   : > { %v1229_v40 = vadd.f32 %v2077_v2, %v1158_v35  ;;  %1095 = vst.msk [vmem:[#allocation2 + $0x28] sm:$0xff] %vm264_vm2, %v1030_v29  ;;  %1358 = vst.msk [vmem:[%s2085_s4 + $0x10] sm:$0xff] %vm264_vm2, %v1294_v31  ;;  %v1324_v43 = vmax.f32 %v1260_v32, 0.0  ;;  %v1295_v44 = vmax.f32 %v1231_v33, 0.0  ;;  %v1261_v45 = vadd.f32 %v2077_v2, %v1190_v41  ;;  %v375_v31 = vld [vmem:[#allocation2 + $0x170] sm:$0xff]  ;;  %v341_v32 = vld [vmem:[#allocation2 + $0x60] sm:$0xff] }
  0xf6   : > { %1127 = vst.msk [vmem:[#allocation2 + $0x128] sm:$0xff] %vm264_vm2, %v1062_v36  ;;  %1390 = vst.msk [vmem:[%s2085_s4 + $0x110] sm:$0xff] %vm264_vm2, %v1326_v37  ;;  %v1327_v48 = vmax.f32 %v1263_v39, 0.0  ;;  %v1659_v50 = vpop.f32.mrb[8].mxu0  ;;  %v373_v36 = vld [vmem:[#allocation2 + $0x160] sm:$0xff]  ;;  %v344_v37 = vld [vmem:[#allocation2 + $0x78] sm:$0xff] }
  0xf7   : > { %1356 = vst.msk [vmem:[%s2085_s4] sm:$0xff] %vm264_vm2, %v1292_v38  ;;  %v1293_v49 = vmax.f32 %v1229_v40, 0.0  ;;  %1388 = vst.msk [vmem:[%s2085_s4 + $0x100] sm:$0xff] %vm264_vm2, %v1324_v43  ;;  %v1325_v53 = vmax.f32 %v1261_v45, 0.0  ;;  %v1035_v54 = vadd.f32 %v1659_v50, %v339_v42  ;;  %v1691_v55 = vpop.f32.mrb[8].mxu1  ;;  %v802_v56 = vpop.f32.mrb[9].mxu0 }
  0xf8   : > { %1359 = vst.msk [vmem:[%s2085_s4 + $0x18] sm:$0xff] %vm264_vm2, %v1295_v44  ;;  %1391 = vst.msk [vmem:[%s2085_s4 + $0x118] sm:$0xff] %vm264_vm2, %v1327_v48  ;;  %v1163_v59 = vld [vmem:[#allocation2 + $0x30] sm:$0xff]  ;;  %v1067_v60 = vadd.f32 %v1691_v55, %v371_v46  ;;  %v1033_v61 = vadd.f32 %v802_v56, %v337_v47  ;;  %v930_v62 = vpop.f32.mrb[9].mxu1  ;;  %v1660_v63 = vpop.f32.mrb[10].mxu0  ;;  %v376_v42 = vld [vmem:[#allocation2 + $0x178] sm:$0xff] }
  0xf9   : > { %1357 = vst.msk [vmem:[%s2085_s4 + $0x8] sm:$0xff] %vm264_vm2, %v1293_v49  ;;  %1389 = vst.msk [vmem:[%s2085_s4 + $0x108] sm:$0xff] %vm264_vm2, %v1325_v53  ;;  %v1234_v1 = vadd.f32 %v2077_v2, %v1163_v59  ;;  %v1195_v3 = vld [vmem:[#allocation2 + $0x130] sm:$0xff]  ;;  %v1161_v4 = vld [vmem:[#allocation2 + $0x20] sm:$0xff]  ;;  %v1065_v5 = vadd.f32 %v930_v62, %v369_v51  ;;  %v1036_v6 = vadd.f32 %v1660_v63, %v340_v52  ;;  %v1692_v7 = vpop.f32.mrb[10].mxu1  ;;  %v805_v8 = vpop.f32.mrb[11].mxu0 }
  0xfa   : > { %1100 = vst.msk [vmem:[#allocation2 + $0x50] sm:$0xff] %vm264_vm2, %v1035_v54  ;;  %v1266_v9 = vadd.f32 %v2077_v2, %v1195_v3  ;;  %v1232_v10 = vadd.f32 %v2077_v2, %v1161_v4  ;;  %v1193_v11 = vld [vmem:[#allocation2 + $0x120] sm:$0xff]  ;;  %v1164_v12 = vld [vmem:[#allocation2 + $0x38] sm:$0xff]  ;;  %1132 = vst.msk [vmem:[#allocation2 + $0x150] sm:$0xff] %vm264_vm2, %v1067_v60  ;;  %v1068_v13 = vadd.f32 %v1692_v7, %v372_v57  ;;  %v933_v15 = vpop.f32.mrb[11].mxu1 }
  0xfb   : > { %1098 = vst.msk [vmem:[#allocation2 + $0x40] sm:$0xff] %vm264_vm2, %v1033_v61  ;;  %v1034_v14 = vadd.f32 %v805_v8, %v338_v58  ;;  %v1298_v16 = vmax.f32 %v1234_v1, 0.0  ;;  %v1264_v17 = vadd.f32 %v2077_v2, %v1193_v11  ;;  %v1235_v18 = vadd.f32 %v2077_v2, %v1164_v12  ;;  %v1196_v19 = vld [vmem:[#allocation2 + $0x138] sm:$0xff]  ;;  %1130 = vst.msk [vmem:[#allocation2 + $0x140] sm:$0xff] %vm264_vm2, %v1065_v5  ;;  %v342_v43 = vld [vmem:[#allocation2 + $0x68] sm:$0xff] }
  0xfc   : > { %v1162_v20 = vld [vmem:[#allocation2 + $0x28] sm:$0xff]  ;;  %1101 = vst.msk [vmem:[#allocation2 + $0x58] sm:$0xff] %vm264_vm2, %v1036_v6  ;;  %v1066_v21 = vadd.f32 %v933_v15, %v370_v0  ;;  %v1330_v22 = vmax.f32 %v1266_v9, 0.0  ;;  %v1296_v23 = vmax.f32 %v1232_v10, 0.0  ;;  %v1267_v24 = vadd.f32 %v2077_v2, %v1196_v19  ;;  %1133 = vst.msk [vmem:[#allocation2 + $0x158] sm:$0xff] %vm264_vm2, %v1068_v13  ;;  %v347_v12 = vld [vmem:[#allocation2 + $0x90] sm:$0xff] }
  0xfd   : > { %v1233_v25 = vadd.f32 %v2077_v2, %v1162_v20  ;;  %v1194_v26 = vld [vmem:[#allocation2 + $0x128] sm:$0xff]  ;;  %1099 = vst.msk [vmem:[#allocation2 + $0x48] sm:$0xff] %vm264_vm2, %v1034_v14  ;;  %1362 = vst.msk [vmem:[%s2085_s4 + $0x30] sm:$0xff] %vm264_vm2, %v1298_v16  ;;  %v1328_v28 = vmax.f32 %v1264_v17, 0.0  ;;  %v1299_v29 = vmax.f32 %v1235_v18, 0.0  ;;  %v379_v16 = vld [vmem:[#allocation2 + $0x190] sm:$0xff] }
  0xfe   : > { %v1265_v30 = vadd.f32 %v2077_v2, %v1194_v26  ;;  %1131 = vst.msk [vmem:[#allocation2 + $0x148] sm:$0xff] %vm264_vm2, %v1066_v21  ;;  %1394 = vst.msk [vmem:[%s2085_s4 + $0x130] sm:$0xff] %vm264_vm2, %v1330_v22  ;;  %v1331_v33 = vmax.f32 %v1267_v24, 0.0  ;;  %v1663_v35 = vpop.f32.mrb[12].mxu0  ;;  %v374_v49 = vld [vmem:[#allocation2 + $0x168] sm:$0xff]  ;;  %v345_v17 = vld [vmem:[#allocation2 + $0x80] sm:$0xff] }
  0xff   : > { %1360 = vst.msk [vmem:[%s2085_s4 + $0x20] sm:$0xff] %vm264_vm2, %v1296_v23  ;;  %v1297_v34 = vmax.f32 %v1233_v25, 0.0  ;;  %1392 = vst.msk [vmem:[%s2085_s4 + $0x120] sm:$0xff] %vm264_vm2, %v1328_v28  ;;  %v1039_v39 = vadd.f32 %v1663_v35, %v343_v27  ;;  %v1695_v40 = vpop.f32.mrb[12].mxu1  ;;  %v818_v41 = vpop.f32.mrb[13].mxu0  ;;  %v377_v21 = vld [vmem:[#allocation2 + $0x180] sm:$0xff] }
 0x100   : > { %1363 = vst.msk [vmem:[%s2085_s4 + $0x38] sm:$0xff] %vm264_vm2, %v1299_v29  ;;  %v1329_v38 = vmax.f32 %v1265_v30, 0.0  ;;  %1395 = vst.msk [vmem:[%s2085_s4 + $0x138] sm:$0xff] %vm264_vm2, %v1331_v33  ;;  %v1071_v45 = vadd.f32 %v1695_v40, %v375_v31  ;;  %v1037_v46 = vadd.f32 %v818_v41, %v341_v32  ;;  %v946_v47 = vpop.f32.mrb[13].mxu1  ;;  %v1664_v48 = vpop.f32.mrb[14].mxu0  ;;  %v348_v22 = vld [vmem:[#allocation2 + $0x98] sm:$0xff] }
 0x101   : > { %1361 = vst.msk [vmem:[%s2085_s4 + $0x28] sm:$0xff] %vm264_vm2, %v1297_v34  ;;  %v1167_v44 = vld [vmem:[#allocation2 + $0x50] sm:$0xff]  ;;  %1104 = vst.msk [vmem:[#allocation2 + $0x70] sm:$0xff] %vm264_vm2, %v1039_v39  ;;  %v1069_v53 = vadd.f32 %v946_v47, %v373_v36  ;;  %v1040_v54 = vadd.f32 %v1664_v48, %v344_v37  ;;  %v1696_v55 = vpop.f32.mrb[14].mxu1  ;;  %v821_v56 = vpop.f32.mrb[15].mxu0  ;;  %v380_v27 = vld [vmem:[#allocation2 + $0x198] sm:$0xff] }
 0x102   : > { %1393 = vst.msk [vmem:[%s2085_s4 + $0x128] sm:$0xff] %vm264_vm2, %v1329_v38  ;;  %v1238_v50 = vadd.f32 %v2077_v2, %v1167_v44  ;;  %v1199_v51 = vld [vmem:[#allocation2 + $0x150] sm:$0xff]  ;;  %v1165_v52 = vld [vmem:[#allocation2 + $0x40] sm:$0xff]  ;;  %1136 = vst.msk [vmem:[#allocation2 + $0x170] sm:$0xff] %vm264_vm2, %v1071_v45  ;;  %v1072_v61 = vadd.f32 %v1696_v55, %v376_v42  ;;  %v1038_v62 = vadd.f32 %v821_v56, %v342_v43  ;;  %v949_v63 = vpop.f32.mrb[15].mxu1 }
 0x103   : > { %v1270_v57 = vadd.f32 %v2077_v2, %v1199_v51  ;;  %v1236_v58 = vadd.f32 %v2077_v2, %v1165_v52  ;;  %v1197_v59 = vld [vmem:[#allocation2 + $0x140] sm:$0xff]  ;;  %v1168_v60 = vld [vmem:[#allocation2 + $0x58] sm:$0xff]  ;;  %1102 = vst.msk [vmem:[#allocation2 + $0x60] sm:$0xff] %vm264_vm2, %v1037_v46  ;;  %1134 = vst.msk [vmem:[#allocation2 + $0x160] sm:$0xff] %vm264_vm2, %v1069_v53  ;;  %v1070_v6 = vadd.f32 %v949_v63, %v374_v49 }
 0x104   : > { %v1302_v0 = vmax.f32 %v1238_v50, 0.0  ;;  %v1268_v1 = vadd.f32 %v2077_v2, %v1197_v59  ;;  %v1239_v3 = vadd.f32 %v2077_v2, %v1168_v60  ;;  %v1200_v4 = vld [vmem:[#allocation2 + $0x158] sm:$0xff]  ;;  %v1166_v5 = vld [vmem:[#allocation2 + $0x48] sm:$0xff]  ;;  %1105 = vst.msk [vmem:[#allocation2 + $0x78] sm:$0xff] %vm264_vm2, %v1040_v54  ;;  %1137 = vst.msk [vmem:[#allocation2 + $0x178] sm:$0xff] %vm264_vm2, %v1072_v61 }
 0x105   : > { %v1334_v7 = vmax.f32 %v1270_v57, 0.0  ;;  %v1300_v8 = vmax.f32 %v1236_v58, 0.0  ;;  %v1271_v9 = vadd.f32 %v2077_v2, %v1200_v4  ;;  %v1237_v10 = vadd.f32 %v2077_v2, %v1166_v5  ;;  %v1198_v11 = vld [vmem:[#allocation2 + $0x148] sm:$0xff]  ;;  %1103 = vst.msk [vmem:[#allocation2 + $0x68] sm:$0xff] %vm264_vm2, %v1038_v62  ;;  %1135 = vst.msk [vmem:[#allocation2 + $0x168] sm:$0xff] %vm264_vm2, %v1070_v6  ;;  %v351_v60 = vld [vmem:[#allocation2 + $0xb0] sm:$0xff] }
 0x106   : > { %1366 = vst.msk [vmem:[%s2085_s4 + $0x50] sm:$0xff] %vm264_vm2, %v1302_v0  ;;  %v1332_v13 = vmax.f32 %v1268_v1, 0.0  ;;  %v1303_v14 = vmax.f32 %v1239_v3, 0.0  ;;  %v1269_v15 = vadd.f32 %v2077_v2, %v1198_v11  ;;  %v1667_v20 = vpop.f32.mrb[16].mxu0  ;;  %v346_v28 = vld [vmem:[#allocation2 + $0x88] sm:$0xff]  ;;  %v383_v0 = vld [vmem:[#allocation2 + $0x1b0] sm:$0xff] }
 0x107   : > { %1398 = vst.msk [vmem:[%s2085_s4 + $0x150] sm:$0xff] %vm264_vm2, %v1334_v7  ;;  %1364 = vst.msk [vmem:[%s2085_s4 + $0x40] sm:$0xff] %vm264_vm2, %v1300_v8  ;;  %v1335_v18 = vmax.f32 %v1271_v9, 0.0  ;;  %v1301_v19 = vmax.f32 %v1237_v10, 0.0  ;;  %v1043_v24 = vadd.f32 %v1667_v20, %v347_v12  ;;  %v1699_v25 = vpop.f32.mrb[16].mxu1  ;;  %v834_v26 = vpop.f32.mrb[17].mxu0 }
 0x108   : > { %1396 = vst.msk [vmem:[%s2085_s4 + $0x140] sm:$0xff] %vm264_vm2, %v1332_v13  ;;  %1367 = vst.msk [vmem:[%s2085_s4 + $0x58] sm:$0xff] %vm264_vm2, %v1303_v14  ;;  %v1333_v23 = vmax.f32 %v1269_v15, 0.0  ;;  %v1171_v29 = vld [vmem:[#allocation2 + $0x70] sm:$0xff]  ;;  %v1075_v30 = vadd.f32 %v1699_v25, %v379_v16  ;;  %v1041_v31 = vadd.f32 %v834_v26, %v345_v17  ;;  %v962_v32 = vpop.f32.mrb[17].mxu1  ;;  %v1668_v33 = vpop.f32.mrb[18].mxu0 }
 0x109   : > { %1399 = vst.msk [vmem:[%s2085_s4 + $0x158] sm:$0xff] %vm264_vm2, %v1335_v18  ;;  %1365 = vst.msk [vmem:[%s2085_s4 + $0x48] sm:$0xff] %vm264_vm2, %v1301_v19  ;;  %v378_v34 = vld [vmem:[#allocation2 + $0x188] sm:$0xff]  ;;  %v1242_v35 = vadd.f32 %v2077_v2, %v1171_v29  ;;  %v1203_v36 = vld [vmem:[#allocation2 + $0x170] sm:$0xff]  ;;  %v1073_v38 = vadd.f32 %v962_v32, %v377_v21  ;;  %v1044_v39 = vadd.f32 %v1668_v33, %v348_v22  ;;  %v1700_v40 = vpop.f32.mrb[18].mxu1  ;;  %v837_v41 = vpop.f32.mrb[19].mxu0 }
 0x10a   : > { %1397 = vst.msk [vmem:[%s2085_s4 + $0x148] sm:$0xff] %vm264_vm2, %v1333_v23  ;;  %v1169_v37 = vld [vmem:[#allocation2 + $0x60] sm:$0xff]  ;;  %1108 = vst.msk [vmem:[#allocation2 + $0x90] sm:$0xff] %vm264_vm2, %v1043_v24  ;;  %v1274_v42 = vadd.f32 %v2077_v2, %v1203_v36  ;;  %v1076_v46 = vadd.f32 %v1700_v40, %v380_v27  ;;  %v1042_v47 = vadd.f32 %v837_v41, %v346_v28  ;;  %v965_v48 = vpop.f32.mrb[19].mxu1  ;;  %v352_v7 = vld [vmem:[#allocation2 + $0xb8] sm:$0xff] }
 0x10b   : > { %v1240_v43 = vadd.f32 %v2077_v2, %v1169_v37  ;;  %v1201_v44 = vld [vmem:[#allocation2 + $0x160] sm:$0xff]  ;;  %v1172_v45 = vld [vmem:[#allocation2 + $0x78] sm:$0xff]  ;;  %1140 = vst.msk [vmem:[#allocation2 + $0x190] sm:$0xff] %vm264_vm2, %v1075_v30  ;;  %1106 = vst.msk [vmem:[#allocation2 + $0x80] sm:$0xff] %vm264_vm2, %v1041_v31  ;;  %v1306_v49 = vmax.f32 %v1242_v35, 0.0  ;;  %v1074_v54 = vadd.f32 %v965_v48, %v378_v34 }
 0x10c   : > { %v1272_v50 = vadd.f32 %v2077_v2, %v1201_v44  ;;  %v1243_v51 = vadd.f32 %v2077_v2, %v1172_v45  ;;  %v1204_v52 = vld [vmem:[#allocation2 + $0x178] sm:$0xff]  ;;  %v1170_v53 = vld [vmem:[#allocation2 + $0x68] sm:$0xff]  ;;  %1138 = vst.msk [vmem:[#allocation2 + $0x180] sm:$0xff] %vm264_vm2, %v1073_v38  ;;  %1109 = vst.msk [vmem:[#allocation2 + $0x98] sm:$0xff] %vm264_vm2, %v1044_v39  ;;  %v1338_v55 = vmax.f32 %v1274_v42, 0.0 }
 0x10d   : > { %v1304_v56 = vmax.f32 %v1240_v43, 0.0  ;;  %v1275_v57 = vadd.f32 %v2077_v2, %v1204_v52  ;;  %v1241_v58 = vadd.f32 %v2077_v2, %v1170_v53  ;;  %v1202_v59 = vld [vmem:[#allocation2 + $0x168] sm:$0xff]  ;;  %1141 = vst.msk [vmem:[#allocation2 + $0x198] sm:$0xff] %vm264_vm2, %v1076_v46  ;;  %1107 = vst.msk [vmem:[#allocation2 + $0x88] sm:$0xff] %vm264_vm2, %v1042_v47  ;;  %v349_v1 = vld [vmem:[#allocation2 + $0xa0] sm:$0xff] }
 0x10e   : > { %1370 = vst.msk [vmem:[%s2085_s4 + $0x70] sm:$0xff] %vm264_vm2, %v1306_v49  ;;  %v1336_v61 = vmax.f32 %v1272_v50, 0.0  ;;  %v1307_v62 = vmax.f32 %v1243_v51, 0.0  ;;  %v1273_v63 = vadd.f32 %v2077_v2, %v1202_v59  ;;  %1139 = vst.msk [vmem:[#allocation2 + $0x188] sm:$0xff] %vm264_vm2, %v1074_v54  ;;  %v1671_v5 = vpop.f32.mrb[20].mxu0  ;;  %v381_v6 = vld [vmem:[#allocation2 + $0x1a0] sm:$0xff] }
 0x10f   : > { %1402 = vst.msk [vmem:[%s2085_s4 + $0x170] sm:$0xff] %vm264_vm2, %v1338_v55  ;;  %1368 = vst.msk [vmem:[%s2085_s4 + $0x60] sm:$0xff] %vm264_vm2, %v1304_v56  ;;  %v1339_v3 = vmax.f32 %v1275_v57, 0.0  ;;  %v1305_v4 = vmax.f32 %v1241_v58, 0.0  ;;  %v1047_v9 = vadd.f32 %v1671_v5, %v351_v60  ;;  %v1703_v10 = vpop.f32.mrb[20].mxu1  ;;  %v850_v11 = vpop.f32.mrb[21].mxu0 }
 0x110   : > { %1400 = vst.msk [vmem:[%s2085_s4 + $0x160] sm:$0xff] %vm264_vm2, %v1336_v61  ;;  %1371 = vst.msk [vmem:[%s2085_s4 + $0x78] sm:$0xff] %vm264_vm2, %v1307_v62  ;;  %v1337_v8 = vmax.f32 %v1273_v63, 0.0  ;;  %v384_v12 = vld [vmem:[#allocation2 + $0x1b8] sm:$0xff]  ;;  %v350_v13 = vld [vmem:[#allocation2 + $0xa8] sm:$0xff]  ;;  %v1079_v15 = vadd.f32 %v1703_v10, %v383_v0  ;;  %v1045_v16 = vadd.f32 %v850_v11, %v349_v1  ;;  %v978_v17 = vpop.f32.mrb[21].mxu1 }
 0x111   : > { %1403 = vst.msk [vmem:[%s2085_s4 + $0x178] sm:$0xff] %vm264_vm2, %v1339_v3  ;;  %1369 = vst.msk [vmem:[%s2085_s4 + $0x68] sm:$0xff] %vm264_vm2, %v1305_v4  ;;  %v1175_v14 = vld [vmem:[#allocation2 + $0x90] sm:$0xff]  ;;  %v1672_v18 = vpop.f32.mrb[22].mxu0  ;;  %v382_v19 = vld [vmem:[#allocation2 + $0x1a8] sm:$0xff]  ;;  %v1077_v23 = vadd.f32 %v978_v17, %v381_v6  ;;  %v1704_v25 = vpop.f32.mrb[22].mxu1 }
 0x112   : > { %1401 = vst.msk [vmem:[%s2085_s4 + $0x168] sm:$0xff] %vm264_vm2, %v1337_v8  ;;  %v1246_v20 = vadd.f32 %v2077_v2, %v1175_v14  ;;  %v1207_v21 = vld [vmem:[#allocation2 + $0x190] sm:$0xff]  ;;  %v1173_v22 = vld [vmem:[#allocation2 + $0x80] sm:$0xff]  ;;  %1112 = vst.msk [vmem:[#allocation2 + $0xb0] sm:$0xff] %vm264_vm2, %v1047_v9  ;;  %v1048_v24 = vadd.f32 %v1672_v18, %v352_v7  ;;  %v853_v26 = vpop.f32.mrb[23].mxu0  ;;  %v1080_v31 = vadd.f32 %v1704_v25, %v384_v12  ;;  %v981_v33 = vpop.f32.mrb[23].mxu1 }
 0x113   : > { %v1278_v27 = vadd.f32 %v2077_v2, %v1207_v21  ;;  %v1244_v28 = vadd.f32 %v2077_v2, %v1173_v22  ;;  %v1205_v29 = vld [vmem:[#allocation2 + $0x180] sm:$0xff]  ;;  %v1176_v30 = vld [vmem:[#allocation2 + $0x98] sm:$0xff]  ;;  %1144 = vst.msk [vmem:[#allocation2 + $0x1b0] sm:$0xff] %vm264_vm2, %v1079_v15  ;;  %1110 = vst.msk [vmem:[#allocation2 + $0xa0] sm:$0xff] %vm264_vm2, %v1045_v16  ;;  %v1046_v32 = vadd.f32 %v853_v26, %v350_v13 }
 0x114   : > { %v1310_v34 = vmax.f32 %v1246_v20, 0.0  ;;  %v1276_v35 = vadd.f32 %v2077_v2, %v1205_v29  ;;  %v1247_v36 = vadd.f32 %v2077_v2, %v1176_v30  ;;  %v1208_v37 = vld [vmem:[#allocation2 + $0x198] sm:$0xff]  ;;  %v1174_v38 = vld [vmem:[#allocation2 + $0x88] sm:$0xff]  ;;  %1142 = vst.msk [vmem:[#allocation2 + $0x1a0] sm:$0xff] %vm264_vm2, %v1077_v23  ;;  %1113 = vst.msk [vmem:[#allocation2 + $0xb8] sm:$0xff] %vm264_vm2, %v1048_v24  ;;  %v1078_v39 = vadd.f32 %v981_v33, %v382_v19 }
 0x115   : > { %v1342_v40 = vmax.f32 %v1278_v27, 0.0  ;;  %v1308_v41 = vmax.f32 %v1244_v28, 0.0  ;;  %v1279_v42 = vadd.f32 %v2077_v2, %v1208_v37  ;;  %v1245_v43 = vadd.f32 %v2077_v2, %v1174_v38  ;;  %v1206_v44 = vld [vmem:[#allocation2 + $0x188] sm:$0xff]  ;;  %1145 = vst.msk [vmem:[#allocation2 + $0x1b8] sm:$0xff] %vm264_vm2, %v1080_v31  ;;  %1111 = vst.msk [vmem:[#allocation2 + $0xa8] sm:$0xff] %vm264_vm2, %v1046_v32  ;;  %v355_v45 = vld [vmem:[#allocation2 + $0xd0] sm:$0xff] }
 0x116   : > { %1374 = vst.msk [vmem:[%s2085_s4 + $0x90] sm:$0xff] %vm264_vm2, %v1310_v34  ;;  %v1340_v46 = vmax.f32 %v1276_v35, 0.0  ;;  %v1311_v47 = vmax.f32 %v1247_v36, 0.0  ;;  %v1277_v48 = vadd.f32 %v2077_v2, %v1206_v44  ;;  %1143 = vst.msk [vmem:[#allocation2 + $0x1a8] sm:$0xff] %vm264_vm2, %v1078_v39  ;;  %v387_v49 = vld [vmem:[#allocation2 + $0x1d0] sm:$0xff]  ;;  %v353_v50 = vld [vmem:[#allocation2 + $0xc0] sm:$0xff] }
 0x117   : > { %1406 = vst.msk [vmem:[%s2085_s4 + $0x190] sm:$0xff] %vm264_vm2, %v1342_v40  ;;  %1372 = vst.msk [vmem:[%s2085_s4 + $0x80] sm:$0xff] %vm264_vm2, %v1308_v41  ;;  %v1343_v51 = vmax.f32 %v1279_v42, 0.0  ;;  %v1309_v52 = vmax.f32 %v1245_v43, 0.0  ;;  %v1675_v53 = vpop.f32.mrb[24].mxu0  ;;  %v385_v54 = vld [vmem:[#allocation2 + $0x1c0] sm:$0xff] }
 0x118   : > { %v356_v55 = vld [vmem:[#allocation2 + $0xd8] sm:$0xff]  ;;  %1404 = vst.msk [vmem:[%s2085_s4 + $0x180] sm:$0xff] %vm264_vm2, %v1340_v46  ;;  %1375 = vst.msk [vmem:[%s2085_s4 + $0x98] sm:$0xff] %vm264_vm2, %v1311_v47  ;;  %v1341_v56 = vmax.f32 %v1277_v48, 0.0  ;;  %v1051_v57 = vadd.f32 %v1675_v53, %v355_v45  ;;  %v1707_v58 = vpop.f32.mrb[24].mxu1  ;;  %v866_v59 = vpop.f32.mrb[25].mxu0 }
 0x119   : > { %v388_v60 = vld [vmem:[#allocation2 + $0x1d8] sm:$0xff]  ;;  %v354_v61 = vld [vmem:[#allocation2 + $0xc8] sm:$0xff]  ;;  %1407 = vst.msk [vmem:[%s2085_s4 + $0x198] sm:$0xff] %vm264_vm2, %v1343_v51  ;;  %1373 = vst.msk [vmem:[%s2085_s4 + $0x88] sm:$0xff] %vm264_vm2, %v1309_v52  ;;  %v1083_v63 = vadd.f32 %v1707_v58, %v387_v49  ;;  %v1049_v0 = vadd.f32 %v866_v59, %v353_v50  ;;  %v994_v1 = vpop.f32.mrb[25].mxu1  ;;  %v1676_v3 = vpop.f32.mrb[26].mxu0 }
 0x11a   : > { %v1179_v62 = vld [vmem:[#allocation2 + $0xb0] sm:$0xff]  ;;  %v386_v4 = vld [vmem:[#allocation2 + $0x1c8] sm:$0xff]  ;;  %1405 = vst.msk [vmem:[%s2085_s4 + $0x188] sm:$0xff] %vm264_vm2, %v1341_v56  ;;  %v1177_v7 = vld [vmem:[#allocation2 + $0xa0] sm:$0xff]  ;;  %v1081_v8 = vadd.f32 %v994_v1, %v385_v54  ;;  %v1052_v9 = vadd.f32 %v1676_v3, %v356_v55  ;;  %v1708_v10 = vpop.f32.mrb[26].mxu1  ;;  %v869_v11 = vpop.f32.mrb[27].mxu0 }
 0x11b   : > { %v1250_v5 = vadd.f32 %v2077_v2, %v1179_v62  ;;  %v1211_v6 = vld [vmem:[#allocation2 + $0x1b0] sm:$0xff]  ;;  %1116 = vst.msk [vmem:[#allocation2 + $0xd0] sm:$0xff] %vm264_vm2, %v1051_v57  ;;  %v1248_v13 = vadd.f32 %v2077_v2, %v1177_v7  ;;  %v1209_v14 = vld [vmem:[#allocation2 + $0x1a0] sm:$0xff]  ;;  %v1180_v15 = vld [vmem:[#allocation2 + $0xb8] sm:$0xff]  ;;  %v1084_v16 = vadd.f32 %v1708_v10, %v388_v60  ;;  %v1050_v17 = vadd.f32 %v869_v11, %v354_v61  ;;  %v997_v18 = vpop.f32.mrb[27].mxu1 }
 0x11c   : > { %v1282_v12 = vadd.f32 %v2077_v2, %v1211_v6  ;;  %1148 = vst.msk [vmem:[#allocation2 + $0x1d0] sm:$0xff] %vm264_vm2, %v1083_v63  ;;  %1114 = vst.msk [vmem:[#allocation2 + $0xc0] sm:$0xff] %vm264_vm2, %v1049_v0  ;;  %v1280_v20 = vadd.f32 %v2077_v2, %v1209_v14  ;;  %v1251_v21 = vadd.f32 %v2077_v2, %v1180_v15  ;;  %v1212_v22 = vld [vmem:[#allocation2 + $0x1b8] sm:$0xff]  ;;  %v1178_v23 = vld [vmem:[#allocation2 + $0xa8] sm:$0xff] }
 0x11d   : > { %v1314_v19 = vmax.f32 %v1250_v5, 0.0  ;;  %1146 = vst.msk [vmem:[#allocation2 + $0x1c0] sm:$0xff] %vm264_vm2, %v1081_v8  ;;  %1117 = vst.msk [vmem:[#allocation2 + $0xd8] sm:$0xff] %vm264_vm2, %v1052_v9  ;;  %v1082_v24 = vadd.f32 %v997_v18, %v386_v4  ;;  %v1312_v26 = vmax.f32 %v1248_v13, 0.0  ;;  %v1283_v27 = vadd.f32 %v2077_v2, %v1212_v22  ;;  %v1210_v29 = vld [vmem:[#allocation2 + $0x1a8] sm:$0xff]  ;;  %v359_v30 = vld [vmem:[#allocation2 + $0xf0] sm:$0xff] }
 0x11e   : > { %v1346_v25 = vmax.f32 %v1282_v12, 0.0  ;;  %v1249_v28 = vadd.f32 %v2077_v2, %v1178_v23  ;;  %1149 = vst.msk [vmem:[#allocation2 + $0x1d8] sm:$0xff] %vm264_vm2, %v1084_v16  ;;  %1115 = vst.msk [vmem:[#allocation2 + $0xc8] sm:$0xff] %vm264_vm2, %v1050_v17  ;;  %v1344_v31 = vmax.f32 %v1280_v20, 0.0  ;;  %v1315_v32 = vmax.f32 %v1251_v21, 0.0  ;;  %v391_v34 = vld [vmem:[#allocation2 + $0x1f0] sm:$0xff] }
 0x11f   : > { %1378 = vst.msk [vmem:[%s2085_s4 + $0xb0] sm:$0xff] %vm264_vm2, %v1314_v19  ;;  %v1281_v33 = vadd.f32 %v2077_v2, %v1210_v29  ;;  %1147 = vst.msk [vmem:[#allocation2 + $0x1c8] sm:$0xff] %vm264_vm2, %v1082_v24  ;;  %v357_v35 = vld [vmem:[#allocation2 + $0xe0] sm:$0xff]  ;;  %v1347_v36 = vmax.f32 %v1283_v27, 0.0  ;;  %v1679_v38 = vpop.f32.mrb[28].mxu0  ;;  %v360_v40 = vld [vmem:[#allocation2 + $0xf8] sm:$0xff] }
 0x120   : > { %1410 = vst.msk [vmem:[%s2085_s4 + $0x1b0] sm:$0xff] %vm264_vm2, %v1346_v25  ;;  %1376 = vst.msk [vmem:[%s2085_s4 + $0xa0] sm:$0xff] %vm264_vm2, %v1312_v26  ;;  %v1313_v37 = vmax.f32 %v1249_v28, 0.0  ;;  %v389_v39 = vld [vmem:[#allocation2 + $0x1e0] sm:$0xff]  ;;  %v1055_v42 = vadd.f32 %v1679_v38, %v359_v30  ;;  %v1711_v43 = vpop.f32.mrb[28].mxu1  ;;  %v882_v44 = vpop.f32.mrb[29].mxu0 }
 0x121   : > { %1408 = vst.msk [vmem:[%s2085_s4 + $0x1a0] sm:$0xff] %vm264_vm2, %v1344_v31  ;;  %1379 = vst.msk [vmem:[%s2085_s4 + $0xb8] sm:$0xff] %vm264_vm2, %v1315_v32  ;;  %v1345_v41 = vmax.f32 %v1281_v33, 0.0  ;;  %v392_v45 = vld [vmem:[#allocation2 + $0x1f8] sm:$0xff]  ;;  %v358_v46 = vld [vmem:[#allocation2 + $0xe8] sm:$0xff]  ;;  %v1087_v48 = vadd.f32 %v1711_v43, %v391_v34  ;;  %v1053_v49 = vadd.f32 %v882_v44, %v357_v35  ;;  %v1010_v50 = vpop.f32.mrb[29].mxu1 }
 0x122   : > { %1411 = vst.msk [vmem:[%s2085_s4 + $0x1b8] sm:$0xff] %vm264_vm2, %v1347_v36  ;;  %1377 = vst.msk [vmem:[%s2085_s4 + $0xa8] sm:$0xff] %vm264_vm2, %v1313_v37  ;;  %v1183_v47 = vld [vmem:[#allocation2 + $0xd0] sm:$0xff]  ;;  %v1680_v51 = vpop.f32.mrb[30].mxu0  ;;  %v390_v52 = vld [vmem:[#allocation2 + $0x1e8] sm:$0xff]  ;;  %v1085_v56 = vadd.f32 %v1010_v50, %v389_v39  ;;  %v1712_v58 = vpop.f32.mrb[30].mxu1 }
 0x123   : > { %1409 = vst.msk [vmem:[%s2085_s4 + $0x1a8] sm:$0xff] %vm264_vm2, %v1345_v41  ;;  %v1254_v53 = vadd.f32 %v2077_v2, %v1183_v47  ;;  %v1215_v54 = vld [vmem:[#allocation2 + $0x1d0] sm:$0xff]  ;;  %v1181_v55 = vld [vmem:[#allocation2 + $0xc0] sm:$0xff]  ;;  %1120 = vst.msk [vmem:[#allocation2 + $0xf0] sm:$0xff] %vm264_vm2, %v1055_v42  ;;  %v1056_v57 = vadd.f32 %v1680_v51, %v360_v40  ;;  %v885_v59 = vpop.f32.mrb[31].mxu0  ;;  %v1088_v0 = vadd.f32 %v1712_v58, %v392_v45  ;;  %v1013_v3 = vpop.f32.mrb[31].mxu1 }
 0x124   : > { %v1286_v60 = vadd.f32 %v2077_v2, %v1215_v54  ;;  %v1252_v61 = vadd.f32 %v2077_v2, %v1181_v55  ;;  %v1213_v62 = vld [vmem:[#allocation2 + $0x1c0] sm:$0xff]  ;;  %v1184_v63 = vld [vmem:[#allocation2 + $0xd8] sm:$0xff]  ;;  %1152 = vst.msk [vmem:[#allocation2 + $0x1f0] sm:$0xff] %vm264_vm2, %v1087_v48  ;;  %1118 = vst.msk [vmem:[#allocation2 + $0xe0] sm:$0xff] %vm264_vm2, %v1053_v49  ;;  %v1054_v1 = vadd.f32 %v885_v59, %v358_v46 }
 0x125   : > { %v1318_v4 = vmax.f32 %v1254_v53, 0.0  ;;  %v1284_v5 = vadd.f32 %v2077_v2, %v1213_v62  ;;  %v1255_v6 = vadd.f32 %v2077_v2, %v1184_v63  ;;  %v1216_v7 = vld [vmem:[#allocation2 + $0x1d8] sm:$0xff]  ;;  %v1182_v8 = vld [vmem:[#allocation2 + $0xc8] sm:$0xff]  ;;  %1150 = vst.msk [vmem:[#allocation2 + $0x1e0] sm:$0xff] %vm264_vm2, %v1085_v56  ;;  %1121 = vst.msk [vmem:[#allocation2 + $0xf8] sm:$0xff] %vm264_vm2, %v1056_v57  ;;  %v1086_v9 = vadd.f32 %v1013_v3, %v390_v52 }
 0x126   : > { %v1350_v10 = vmax.f32 %v1286_v60, 0.0  ;;  %v1316_v11 = vmax.f32 %v1252_v61, 0.0  ;;  %v1287_v12 = vadd.f32 %v2077_v2, %v1216_v7  ;;  %v1253_v13 = vadd.f32 %v2077_v2, %v1182_v8  ;;  %v1214_v14 = vld [vmem:[#allocation2 + $0x1c8] sm:$0xff]  ;;  %1153 = vst.msk [vmem:[#allocation2 + $0x1f8] sm:$0xff] %vm264_vm2, %v1088_v0  ;;  %1119 = vst.msk [vmem:[#allocation2 + $0xe8] sm:$0xff] %vm264_vm2, %v1054_v1 }
 0x127   : > { %1382 = vst.msk [vmem:[%s2085_s4 + $0xd0] sm:$0xff] %vm264_vm2, %v1318_v4  ;;  %v1348_v15 = vmax.f32 %v1284_v5, 0.0  ;;  %v1319_v16 = vmax.f32 %v1255_v6, 0.0  ;;  %v1285_v17 = vadd.f32 %v2077_v2, %v1214_v14  ;;  %1151 = vst.msk [vmem:[#allocation2 + $0x1e8] sm:$0xff] %vm264_vm2, %v1086_v9 }
 0x128   : > { %1414 = vst.msk [vmem:[%s2085_s4 + $0x1d0] sm:$0xff] %vm264_vm2, %v1350_v10  ;;  %1380 = vst.msk [vmem:[%s2085_s4 + $0xc0] sm:$0xff] %vm264_vm2, %v1316_v11  ;;  %v1351_v18 = vmax.f32 %v1287_v12, 0.0  ;;  %v1317_v19 = vmax.f32 %v1253_v13, 0.0 }
 0x129   : > { %1412 = vst.msk [vmem:[%s2085_s4 + $0x1c0] sm:$0xff] %vm264_vm2, %v1348_v15  ;;  %1383 = vst.msk [vmem:[%s2085_s4 + $0xd8] sm:$0xff] %vm264_vm2, %v1319_v16  ;;  %v1349_v20 = vmax.f32 %v1285_v17, 0.0 }
 0x12a   : > { %1415 = vst.msk [vmem:[%s2085_s4 + $0x1d8] sm:$0xff] %vm264_vm2, %v1351_v18  ;;  %1381 = vst.msk [vmem:[%s2085_s4 + $0xc8] sm:$0xff] %vm264_vm2, %v1317_v19  ;;  %v1187_v21 = vld [vmem:[#allocation2 + $0xf0] sm:$0xff] }
 0x12b   : > { %1413 = vst.msk [vmem:[%s2085_s4 + $0x1c8] sm:$0xff] %vm264_vm2, %v1349_v20  ;;  %v1258_v22 = vadd.f32 %v2077_v2, %v1187_v21  ;;  %v1219_v23 = vld [vmem:[#allocation2 + $0x1f0] sm:$0xff]  ;;  %v1185_v24 = vld [vmem:[#allocation2 + $0xe0] sm:$0xff] }
 0x12c   : > { %v1290_v25 = vadd.f32 %v2077_v2, %v1219_v23  ;;  %v1256_v26 = vadd.f32 %v2077_v2, %v1185_v24  ;;  %v1217_v27 = vld [vmem:[#allocation2 + $0x1e0] sm:$0xff]  ;;  %v1188_v28 = vld [vmem:[#allocation2 + $0xf8] sm:$0xff] }
 0x12d   : > { %v1322_v29 = vmax.f32 %v1258_v22, 0.0  ;;  %v1288_v30 = vadd.f32 %v2077_v2, %v1217_v27  ;;  %v1259_v31 = vadd.f32 %v2077_v2, %v1188_v28  ;;  %v1220_v32 = vld [vmem:[#allocation2 + $0x1f8] sm:$0xff]  ;;  %v1186_v33 = vld [vmem:[#allocation2 + $0xe8] sm:$0xff] }
 0x12e   : > { %v1354_v34 = vmax.f32 %v1290_v25, 0.0  ;;  %v1320_v35 = vmax.f32 %v1256_v26, 0.0  ;;  %v1291_v36 = vadd.f32 %v2077_v2, %v1220_v32  ;;  %v1257_v37 = vadd.f32 %v2077_v2, %v1186_v33  ;;  %v1218_v38 = vld [vmem:[#allocation2 + $0x1e8] sm:$0xff] }
 0x12f   : > { %1386 = vst.msk [vmem:[%s2085_s4 + $0xf0] sm:$0xff] %vm264_vm2, %v1322_v29  ;;  %v1352_v39 = vmax.f32 %v1288_v30, 0.0  ;;  %v1323_v40 = vmax.f32 %v1259_v31, 0.0  ;;  %v1289_v41 = vadd.f32 %v2077_v2, %v1218_v38 }
 0x130   : > { %1418 = vst.msk [vmem:[%s2085_s4 + $0x1f0] sm:$0xff] %vm264_vm2, %v1354_v34  ;;  %1384 = vst.msk [vmem:[%s2085_s4 + $0xe0] sm:$0xff] %vm264_vm2, %v1320_v35  ;;  %v1355_v42 = vmax.f32 %v1291_v36, 0.0  ;;  %v1321_v43 = vmax.f32 %v1257_v37, 0.0 }
 0x131   : > { %1416 = vst.msk [vmem:[%s2085_s4 + $0x1e0] sm:$0xff] %vm264_vm2, %v1352_v39  ;;  %1387 = vst.msk [vmem:[%s2085_s4 + $0xf8] sm:$0xff] %vm264_vm2, %v1323_v40  ;;  %v1353_v44 = vmax.f32 %v1289_v41, 0.0 }
 0x132   : > { %1419 = vst.msk [vmem:[%s2085_s4 + $0x1f8] sm:$0xff] %vm264_vm2, %v1355_v42  ;;  %1385 = vst.msk [vmem:[%s2085_s4 + $0xe8] sm:$0xff] %vm264_vm2, %v1321_v43 }
 0x133   : > { %1417 = vst.msk [vmem:[%s2085_s4 + $0x1e8] sm:$0xff] %vm264_vm2, %v1353_v44 }
 0x134 PF: > { %s13_s14 = sadd.s32 1, %s1799_s14   ;;  %s2347_s12 = smov %s1795_s13 }
 0x135   : > { %p10_p5 = scmp.ge.s32.totalorder %s13_s14, 4   ;;  %s2348_s13 = smov %s2350_s15 }
 0x137   :  { %12 = sbr.rel (!%p10_p5) target bundleno = 2 (0x2), region = 76 }

</bundles_post_ra>
